<compile_context>
chip_gen: v6e
topology: v6e:2x2x1
jax: 0.10.0
libtpu: 0.0.40
codegen_flags: <defaults>
</compile_context>

<pallas_src>
import jax
import jax.numpy as jnp
from jax.experimental import pallas as pl
from jax.experimental.pallas import tpu as pltpu


def _make_mlp_kernel(n_layers: int, use_relu: bool, use_bf16: bool):
    """Builds a fused-MLP kernel body (feature-major / transposed layout)."""

    def kernel(*refs):
        # refs = (xT_ref, w0, b0, w1, b1, ..., w_{L-1}, b_{L-1}, oT_ref)
        x_ref = refs[0]
        o_ref = refs[-1]
        wb = refs[1:-1]

        # h: (d, tile_b) -- batch on the lane axis, f32 on the elementwise path.
        h = x_ref[...].astype(jnp.float32)
        for l in range(n_layers):
            w = wb[2 * l][...]            # (d_out, d_in)  bf16 (or f32)
            b = wb[2 * l + 1][...]        # (d_out, 1)     f32, broadcasts over lanes
            rhs = h.astype(w.dtype) if use_bf16 else h
            h = jnp.dot(w, rhs, preferred_element_type=jnp.float32) + b
            if use_relu and l < n_layers - 1:      # last layer: no activation
                h = jnp.maximum(h, 0.0)            # ReLU in f32 (v5e VPU has no bf16)
        o_ref[...] = h.astype(o_ref.dtype)

    return kernel


def _pick_tile_b(batch: int, max_tile: int = 4096) -> int:
    """Large lane-dense batch tile; keep >= 2 grid steps so v7x's 2 TCs share work."""
    if batch <= 256 or batch % 256 != 0:
        return batch
    t = min(max_tile, batch // 2)
    t = (t // 128) * 128
    while t > 128 and batch % t != 0:
        t -= 128
    return t if (t > 0 and batch % t == 0) else batch


def feedforward_nn(x, weights, biases, *, use_relu=True, use_bf16=True, tile_b=None):
    """Fused MLP forward.

    x:        (B, in_dim) float32
    weights:  list of (d_out, d_in) arrays (torch nn.Linear layout)
    biases:   list of (d_out,) arrays
    """
    n_layers = len(weights)
    B, in_dim = x.shape
    out_dim = weights[-1].shape[0]
    if tile_b is None:
        tile_b = _pick_tile_b(B)
    assert B % tile_b == 0, "batch must be divisible by tile_b"
    assert tile_b == B or tile_b % 128 == 0, "partial batch tiles must be 128-aligned"

    mat_dtype = jnp.bfloat16 if use_bf16 else jnp.float32

    # Layout plumbing (outside the kernel): put the batch on the lane axis.
    xT = jnp.transpose(x)                                  # (in_dim, B)

    args = [xT]
    in_specs = [pl.BlockSpec((in_dim, tile_b), lambda i: (0, i))]
    for w, b in zip(weights, biases):
        d_out, d_in = w.shape
        # Weights/biases are tiny (<6 KB total); constant index_maps keep them
        # VMEM-resident across the whole grid -- no extra buffering wanted.
        args.append(w.astype(mat_dtype))
        args.append(b.reshape(d_out, 1).astype(jnp.float32))
        in_specs.append(pl.BlockSpec((d_out, d_in), lambda i: (0, 0)))
        in_specs.append(pl.BlockSpec((d_out, 1), lambda i: (0, 0)))

    out_spec = pl.BlockSpec((out_dim, tile_b), lambda i: (0, i))

    kernel = _make_mlp_kernel(n_layers, use_relu, use_bf16)

    # Advisory cost hint so XLA schedules surrounding ops sensibly.
    itemsize = jnp.dtype(x.dtype).itemsize
    w_itemsize = jnp.dtype(mat_dtype).itemsize
    flops = 2 * B * sum(int(w.shape[0]) * int(w.shape[1]) for w in weights)
    bytes_accessed = (
        B * (in_dim + out_dim) * itemsize
        + sum(int(w.size) * w_itemsize for w in weights)
        + sum(int(b.size) * 4 for b in biases)
    )

    outT = pl.pallas_call(
        kernel,
        out_shape=jax.ShapeDtypeStruct((out_dim, B), x.dtype),
        grid_spec=pltpu.PrefetchScalarGridSpec(
            num_scalar_prefetch=0,
            grid=(B // tile_b,),
            in_specs=in_specs,
            out_specs=out_spec,
        ),
        compiler_params=pltpu.CompilerParams(
            dimension_semantics=("parallel",),   # batch tiles shard across v7x's 2 TCs
        ),
        cost_estimate=pl.CostEstimate(
            flops=flops, transcendentals=0, bytes_accessed=bytes_accessed),
    )(*args)
    return jnp.transpose(outT)                             # back to (B, out_dim)


def feedforward_nn_ref(x, weights, biases, *, use_relu=True, use_bf16=False):
    """Pure-JAX reference with identical semantics (weights in (out, in) layout)."""
    h = x.astype(jnp.float32)
    n_layers = len(weights)
    for l, (w, b) in enumerate(zip(weights, biases)):
        if use_bf16:
            hh, ww = h.astype(jnp.bfloat16), w.astype(jnp.bfloat16)
        else:
            hh, ww = h, w
        h = jnp.dot(hh, ww.T, preferred_element_type=jnp.float32) + b
        if use_relu and l < n_layers - 1:
            h = jnp.maximum(h, 0.0)
    return h.astype(x.dtype)


def init_params(key, in_dim, hidden_dim, out_dim, n_layers):
    """Deterministic init matching nn.Linear ((out, in) weight layout + bounds)."""
    dims = [in_dim] + [hidden_dim] * (n_layers - 1) + [out_dim]
    weights, biases = [], []
    for l in range(n_layers):
        key, kw, kb = jax.random.split(key, 3)
        d_in, d_out = dims[l], dims[l + 1]
        bound = 1.0 / jnp.sqrt(d_in)
        # torch.nn.Linear uses U(-1/sqrt(fan_in), 1/sqrt(fan_in)) for W and b.
        w = jax.random.uniform(kw, (d_out, d_in), jnp.float32, -bound, bound)
        b = jax.random.uniform(kb, (d_out,), jnp.float32, -bound, bound)
        weights.append(w)
        biases.append(b)
    return weights, biases


if __name__ == "__main__":
    in_dim, hidden_dim, out_dim, n_layers = 16, 32, 8, 3
    batch = 1024   # tiled as 2 x 512 lane-dense batch tiles (one per v7x TensorCore)

    key = jax.random.PRNGKey(0)
    key, kx = jax.random.split(key)
    x = jax.random.normal(kx, (batch, in_dim), jnp.float32)
    weights, biases = init_params(key, in_dim, hidden_dim, out_dim, n_layers)

    # (a) exact-semantics f32 path.
    out_f32 = jax.block_until_ready(
        feedforward_nn(x, weights, biases, use_relu=True, use_bf16=False))
    ref_f32 = feedforward_nn_ref(x, weights, biases, use_relu=True, use_bf16=False)
    assert out_f32.shape == (batch, out_dim)
    assert jnp.allclose(out_f32, ref_f32, atol=1e-5, rtol=1e-5), "f32 mismatch vs reference"

    # (b) optimized bf16-operand / f32-accumulate path (MXU fast path).
    out_bf16 = jax.block_until_ready(
        feedforward_nn(x, weights, biases, use_relu=True, use_bf16=True))
    ref_bf16 = feedforward_nn_ref(x, weights, biases, use_relu=True, use_bf16=True)
    assert jnp.allclose(out_bf16, ref_bf16, atol=1e-4, rtol=1e-4), "bf16 mismatch vs reference"
    assert jnp.allclose(out_bf16, ref_f32, atol=5e-2, rtol=5e-2), "bf16 drifted too far from f32"

    print("KERNEL_OK")
</pallas_src>

<mosaic_0001>
module attributes {stable_mosaic.version = 11 : i64} {
  func.func @kernel(%arg0: i32, %arg1: memref<16x512xf32, #tpu.memory_space<vmem>>, %arg2: memref<32x16xf32, #tpu.memory_space<vmem>>, %arg3: memref<32x1xf32, #tpu.memory_space<vmem>>, %arg4: memref<32x32xf32, #tpu.memory_space<vmem>>, %arg5: memref<32x1xf32, #tpu.memory_space<vmem>>, %arg6: memref<8x32xf32, #tpu.memory_space<vmem>>, %arg7: memref<8x1xf32, #tpu.memory_space<vmem>>, %arg8: memref<8x512xf32, #tpu.memory_space<vmem>>) attributes {dimension_semantics = [#tpu.dimension_semantics<parallel>], iteration_bounds = array<i64: 2>, scalar_prefetch = 0 : i64, scratch_operands = 0 : i64, tpu.core_type = #tpu.core_type<tc>, window_params = [{transform_indices = @transform_0, window_bounds = array<i64: 16, 512>}, {pipeline_mode = #tpu.pipeline_mode<synchronous>, transform_indices = @transform_1, window_bounds = array<i64: 32, 16>}, {pipeline_mode = #tpu.pipeline_mode<synchronous>, transform_indices = @transform_2, window_bounds = array<i64: 32, 1>}, {pipeline_mode = #tpu.pipeline_mode<synchronous>, transform_indices = @transform_3, window_bounds = array<i64: 32, 32>}, {pipeline_mode = #tpu.pipeline_mode<synchronous>, transform_indices = @transform_4, window_bounds = array<i64: 32, 1>}, {pipeline_mode = #tpu.pipeline_mode<synchronous>, transform_indices = @transform_5, window_bounds = array<i64: 8, 32>}, {pipeline_mode = #tpu.pipeline_mode<synchronous>, transform_indices = @transform_6, window_bounds = array<i64: 8, 1>}, {transform_indices = @transform_7, window_bounds = array<i64: 8, 512>}]} {
    %c0 = arith.constant 0 : index
    %c0_0 = arith.constant 0 : index
    %0 = vector.load %arg1[%c0, %c0_0] : memref<16x512xf32, #tpu.memory_space<vmem>>, vector<16x512xf32>
    %c0_1 = arith.constant 0 : index
    %c0_2 = arith.constant 0 : index
    %1 = vector.load %arg2[%c0_1, %c0_2] : memref<32x16xf32, #tpu.memory_space<vmem>>, vector<32x16xf32>
    %c0_3 = arith.constant 0 : index
    %c0_4 = arith.constant 0 : index
    %2 = vector.load %arg3[%c0_3, %c0_4] : memref<32x1xf32, #tpu.memory_space<vmem>>, vector<32x1xf32>
    %cst = arith.constant dense<0.000000e+00> : vector<32x512xf32>
    %3 = tpu.matmul %1, %0, %cst {dimension_numbers = #tpu.dot_dimension_numbers<[1], [0], [0], [1], [0, 0, 1, 1], [], []>} : vector<32x16xf32>, vector<16x512xf32>, vector<32x512xf32> -> vector<32x512xf32>
    %4 = vector.broadcast %2 : vector<32x1xf32> to vector<32x512xf32>
    %5 = arith.addf %3, %4 : vector<32x512xf32>
    %cst_5 = arith.constant 0.000000e+00 : f32
    %6 = vector.broadcast %cst_5 : f32 to vector<32x512xf32>
    %7 = arith.maximumf %5, %6 : vector<32x512xf32>
    %c0_6 = arith.constant 0 : index
    %c0_7 = arith.constant 0 : index
    %8 = vector.load %arg4[%c0_6, %c0_7] : memref<32x32xf32, #tpu.memory_space<vmem>>, vector<32x32xf32>
    %c0_8 = arith.constant 0 : index
    %c0_9 = arith.constant 0 : index
    %9 = vector.load %arg5[%c0_8, %c0_9] : memref<32x1xf32, #tpu.memory_space<vmem>>, vector<32x1xf32>
    %cst_10 = arith.constant dense<0.000000e+00> : vector<32x512xf32>
    %10 = tpu.matmul %8, %7, %cst_10 {dimension_numbers = #tpu.dot_dimension_numbers<[1], [0], [0], [1], [0, 0, 1, 1], [], []>} : vector<32x32xf32>, vector<32x512xf32>, vector<32x512xf32> -> vector<32x512xf32>
    %11 = vector.broadcast %9 : vector<32x1xf32> to vector<32x512xf32>
    %12 = arith.addf %10, %11 : vector<32x512xf32>
    %cst_11 = arith.constant 0.000000e+00 : f32
    %13 = vector.broadcast %cst_11 : f32 to vector<32x512xf32>
    %14 = arith.maximumf %12, %13 : vector<32x512xf32>
    %c0_12 = arith.constant 0 : index
    %c0_13 = arith.constant 0 : index
    %15 = vector.load %arg6[%c0_12, %c0_13] : memref<8x32xf32, #tpu.memory_space<vmem>>, vector<8x32xf32>
    %c0_14 = arith.constant 0 : index
    %c0_15 = arith.constant 0 : index
    %16 = vector.load %arg7[%c0_14, %c0_15] : memref<8x1xf32, #tpu.memory_space<vmem>>, vector<8x1xf32>
    %cst_16 = arith.constant dense<0.000000e+00> : vector<8x512xf32>
    %17 = tpu.matmul %15, %14, %cst_16 {dimension_numbers = #tpu.dot_dimension_numbers<[1], [0], [0], [1], [0, 0, 1, 1], [], []>} : vector<8x32xf32>, vector<32x512xf32>, vector<8x512xf32> -> vector<8x512xf32>
    %18 = vector.broadcast %16 : vector<8x1xf32> to vector<8x512xf32>
    %19 = arith.addf %17, %18 : vector<8x512xf32>
    %c0_17 = arith.constant 0 : index
    %c0_18 = arith.constant 0 : index
    %20 = vector.load %arg8[%c0_17, %c0_18] : memref<8x512xf32, #tpu.memory_space<vmem>>, vector<8x512xf32>
    tpu.vector_store %arg8[%c0_17, %c0_18], %19 {strides = array<i32>} : memref<8x512xf32, #tpu.memory_space<vmem>>, vector<8x512xf32>,
    return
  }
  func.func @transform_0(%arg0: i32) -> (i32, i32) {
    %c0_i32 = arith.constant 0 : i32
    %c0_i32_0 = arith.constant 0 : i32
    return %c0_i32, %arg0 : i32, i32
  }
  func.func @transform_1(%arg0: i32) -> (i32, i32) {
    %c0_i32 = arith.constant 0 : i32
    %c0_i32_0 = arith.constant 0 : i32
    %c0_i32_1 = arith.constant 0 : i32
    return %c0_i32, %c0_i32_0 : i32, i32
  }
  func.func @transform_2(%arg0: i32) -> (i32, i32) {
    %c0_i32 = arith.constant 0 : i32
    %c0_i32_0 = arith.constant 0 : i32
    %c0_i32_1 = arith.constant 0 : i32
    return %c0_i32, %c0_i32_0 : i32, i32
  }
  func.func @transform_3(%arg0: i32) -> (i32, i32) {
    %c0_i32 = arith.constant 0 : i32
    %c0_i32_0 = arith.constant 0 : i32
    %c0_i32_1 = arith.constant 0 : i32
    return %c0_i32, %c0_i32_0 : i32, i32
  }
  func.func @transform_4(%arg0: i32) -> (i32, i32) {
    %c0_i32 = arith.constant 0 : i32
    %c0_i32_0 = arith.constant 0 : i32
    %c0_i32_1 = arith.constant 0 : i32
    return %c0_i32, %c0_i32_0 : i32, i32
  }
  func.func @transform_5(%arg0: i32) -> (i32, i32) {
    %c0_i32 = arith.constant 0 : i32
    %c0_i32_0 = arith.constant 0 : i32
    %c0_i32_1 = arith.constant 0 : i32
    return %c0_i32, %c0_i32_0 : i32, i32
  }
  func.func @transform_6(%arg0: i32) -> (i32, i32) {
    %c0_i32 = arith.constant 0 : i32
    %c0_i32_0 = arith.constant 0 : i32
    %c0_i32_1 = arith.constant 0 : i32
    return %c0_i32, %c0_i32_0 : i32, i32
  }
  func.func @transform_7(%arg0: i32) -> (i32, i32) {
    %c0_i32 = arith.constant 0 : i32
    %c0_i32_0 = arith.constant 0 : i32
    return %c0_i32, %arg0 : i32, i32
  }
}

</mosaic_0001>

<bundles_post_ra>
// kernel: tpu_custom_call.1
= control target key start
LH: loop header
LB: loop body
LE: loop exit
PB: predicated region body
PF: predicated region fallthrough
CT: control target
= control target key end

     0   :  { %12 = vsyncpa [#allocation3], 0  ;;  %s1485_s0 = inlined_call_operand.hbm [shape: f32[16,1024], index: 0, kind: input, shape index: {}]   ;;  %s1486_s1 = inlined_call_operand.vmem [shape: f32[32,16], index: 1, kind: input, shape index: {}]   ;;  %s1487_s2 = inlined_call_operand.vmem [shape: f32[32,1], index: 2, kind: input, shape index: {}]   ;;  %s1488_s3 = inlined_call_operand.vmem [shape: f32[32,32], index: 3, kind: input, shape index: {}]   ;;  %s1489_s4 = inlined_call_operand.vmem [shape: f32[32,1], index: 4, kind: input, shape index: {}]   ;;  %s1490_s5 = inlined_call_operand.vmem [shape: f32[8,32], index: 5, kind: input, shape index: {}]   ;;  %s1491_s6 = inlined_call_operand.vmem [shape: f32[8,1], index: 6, kind: input, shape index: {}]   ;;  %s1492_s7 = inlined_call_operand.hbm [shape: f32[8,1024], index: 7, kind: output, shape index: {}]  }
   0x1   :  { %14 = vsyncpa [#allocation3 + $0x1], 0 }
   0x2   :  { %15 = vsyncpa [#allocation4], 0 }
   0x3   :  { %17 = vsyncpa [#allocation4 + $0x1], 0  ;;  %s1246_s24 = smov 0   ;;  %s1248_s25 = smov 0  }
   0x4   :  { %s1250_s26 = smov 0   ;;  %s1252_s27 = smov 0  }
   0x5 LB: > { %s1267_s28 = sadd.s32 4294967295, %s1197_s27   ;;  %s1018_s29 = sadd.s32 4294967294, %s1197_s27   ;;  %s1197_s27 = sphi %s1252_s27, %s1508_s27   ;;  %s1193_s26 = sphi %s1250_s26, %s1507_s26   ;;  %s1189_s25 = sphi %s1248_s25, %s1506_s25   ;;  %s1185_s24 = sphi %s1246_s24, %s1505_s24  }
   0x6   : > { %s1271_s30 = sadd.s32 1, %s1197_s27   ;;  %s30_s8 = sadd.s32 1, %s1193_s26 }
   0x7   : > { %s27_s9 = ssub.s32 %s1197_s27, %s1271_s30  ;;  %p37_p0 = scmp.ne.s32.totalorder %s1193_s26, %s1189_s25 }
   0x8   : > { %p28_p1 = scmp.eq.s32.totalorder %s27_s9, 0  ;;  %p38_p2 = scmp.eq.s32.totalorder %s1197_s27, 0 }
   0x9   : > { %p43_p3 = scmp.ne.s32.totalorder %s1189_s25, %s1185_s24  ;;  %p44_p4 = scmp.eq.s32.totalorder %s1267_s28, 0 }
   0xa   : > { %s1283_s10 = scalar_select %p28_p1, %s1193_s26, %s30_s8  }
   0xb   : > { %p1285_p5 = por %p38_p2, %p37_p0  ;;  %p1289_p6 = por %p44_p4, %p43_p3 }
   0xc   : > { %p193_p7 = scmp.eq.s32.totalorder %s1267_s28, 1  ;;  %p199_p8 = scmp.eq.s32.totalorder %s1018_s29, 1 }
   0xd   : > { %s1496_s12 = scalar_select %p1289_p6, 1, 0 }
   0xe   : > { %p1064_p10 = scmp.lt.s32.totalorder %s1197_s27, 2  ;;  %p1296_p11 = por %p193_p7, %p37_p0 }
   0xf   : > { %p1300_p12 = por %p199_p8, %p43_p3  ;;  %s237_s15 = sand.u32 1, %s1193_s26  }
  0x10   : > { %s1497_s13 = scalar_select %p1296_p11, 1, 0 }
  0x11   : > { %s1498_s14 = scalar_select %p1300_p12, 1, 0 }
  0x12   : > { %s1050_s16 = sshll.u32 %s1197_s27, 9  ;;  %s1021_s17 = sshll.u32 %s237_s15, 6 }
  0x13   : > { %s1309_s20 = scalar_lea.hbm %s1485_s0, %s1050_s16  ;;  %s241_s21 = scalar_lea.vmem [#allocation2], %s1021_s17 }
  0x14   : > { %s248_s22 = sshll.u32 %s241_s21, 4  ;;  %p1313_p13 = pnand %p1064_p10, %p1285_p5  ;;  %s1317_s22 = int_to_ptr.vmem [resolvable:$true] %s248_s22 }
  0x15   : > { %s1320_s29 = scalar_lea.sflag [#allocation3], %s237_s15  ;;  %s1105_s8 = scalar_lea.hbm %s1309_s20, 1024 }
  0x16   : > { %p1106_p1 = scmp.ne.s32.totalorder %s1309_s20, %s1105_s8  ;;  %p1107_p2 = pneg %p1313_p13 }
  0x17   : > { %s1110_s11 = scalar_lea.hbm %s1485_s0, 2048  ;;  %p1111_p5 = scmp.lt.s32.totalorder %s1309_s20, %s1485_s0 }
  0x18   : > { %p1108_p3 = pnand %p1107_p2, %p1106_p1  ;;  %p1112_p7 = scmp.lt.s32.totalorder %s1110_s11, %s1105_s8 }
  0x1a   : > { %p1109_p4 = pneg %p1108_p3  ;;  %p1113_p8 = por %p1112_p7, %p1111_p5 }
  0x1c   : > { %p1114_p10 = pnand %p1113_p8, %p1109_p4 }
  0x1e   : > { %1117 = shalt.err (!%p1114_p10)
}
  0x1f   : > { %s1118_s15 = scalar_lea.vmem %s1317_s22, 1024  ;;  %s1199_s19 = smov [#allocation2]  }
  0x20   : > { %p1119_p9 = scmp.ne.s32.totalorder %s1317_s22, %s1118_s15  ;;  %s1123_s21 = sshll.u32 %s1199_s19, 4  ;;  %s1124_s21 = int_to_ptr.vmem [resolvable:$false] %s1123_s21 }
  0x21   : > { %s1125_s9 = scalar_lea.vmem %s1124_s21, 2048  ;;  %p1126_p3 = scmp.lt.s32.totalorder %s1317_s22, %s1124_s21 }
  0x22   : > { %p1121_p0 = pnand %p1119_p9, %p1107_p2  ;;  %p1127_p12 = scmp.lt.s32.totalorder %s1125_s9, %s1118_s15 }
  0x24   : > { %p1122_p1 = pneg %p1121_p0  ;;  %p1128_p11 = por %p1127_p12, %p1126_p3 }
  0x26   : > { %p1129_p6 = pnand %p1128_p11, %p1122_p1 }
  0x28   : > { %1132 = shalt.err (!%p1129_p6)
}
  0x29   : > { %s1200_s8 = smov 1024   ;;  %s1201_s16 = smov 512  }
  0x2a   : > { %s1202_s11 = smov 32   ;;  %p256_p9 = scmp.lt.s32.totalorder %s1197_s27, 3 }
  0x2b   : > { %1059 = dma.hbm_to_vmem [thread:$0]  (!%p1313_p13), %s1309_s20, 1024, %s1317_s22, %s1320_s29, %s1200_s8, %s1201_s16, %s1202_s11  }
  0x2c   : > { %p1500_p0 = scmp.ge.s32.totalorder %s1197_s27, 1 }
  0x2e   : > { %p257_p2 = pnand %p1500_p0, %p256_p9 }
  0x2f   : > { %s1345_s17 = sand.u32 (!%p257_p2), 1, %s1189_s25   ;;  %p1501_p6 = scmp.ne.s32.totalorder (!%p257_p2), %s1496_s12, 0 }
  0x30   : > { %260 = sbr.rel (%p257_p2) target bundleno = 709 (0x2c5), region = 48  ;;  %s1025_s18 = sshll.u32 (!%p257_p2), %s1345_s17, 6 }
  0x31   : > { %s263_s15 = scalar_lea.sflag (!%p257_p2), [#allocation3], %s1345_s17  ;;  %s266_s19 = scalar_lea.vmem (!%p257_p2), [#allocation2], %s1025_s18 }
  0x35   : > { %1176 = dma.done.wait (%p1501_p6), %s263_s15, 1024  }
  0x36   : > { %1178 = vsyncadd (%p1501_p6), %s263_s15, 4294966272  ;;  %v1203_v0 = vmov 0.0   ;;  %v1204_v1 = vmov 0   ;;  %v304_v2 = vld [vmem:[%s266_s19 + $0x28] sm:$0xff]  ;;  %v306_v3 = vld [vmem:[%s266_s19 + $0x38] sm:$0xff]  ;;  %vm335_vm0 = vcmask 130048  }
  0x37   : > { %412 = vmatprep.mubr.f32.mxu0 %v1203_v0  ;;  %501 = vmatprep.mubr.f32.mxu1 %v1203_v0  ;;  %v303_v4 = vld [vmem:[%s266_s19 + $0x20] sm:$0xff]  ;;  %v305_v5 = vld [vmem:[%s266_s19 + $0x30] sm:$0xff]  ;;  %v300_v6 = vld [vmem:[%s266_s19 + $0x8] sm:$0xff]  ;;  %vm570_vm1 = vcmask 261120   ;;  %s1026_s18 = sshll.u32 %s1345_s17, 5  ;;  %s1051_s15 = sshll.u32 %s1267_s28, 9 }
  0x38   : > { %1104 = vset.pattern.permute.xlu1 %v1204_v1  ;;  %1103 = vset.pattern.permute.xlu0 %v1204_v1  ;;  %v302_v7 = vld [vmem:[%s266_s19 + $0x18] sm:$0xff]  ;;  %v299_v8 = vld [vmem:[%s266_s19] sm:$0xff]  ;;  %v301_v9 = vld [vmem:[%s266_s19 + $0x10] sm:$0xff]  ;;  %s296_s19 = scalar_lea.vmem [#allocation5], %s1026_s18  ;;  %s1448_s23 = scalar_lea.hbm %s1492_s7, %s1051_s15 }
  0x39   : > { %376 = vmatprep.subr.mxu0 %v304_v2  ;;  %465 = vmatprep.subr.mxu1 %v306_v3  ;;  %v307_v10 = vld [vmem:[%s1486_s1] sm:$0xff]  ;;  %v314_v11 = vld [vmem:[%s1487_s2 + $0x18] sm:$0xff]  ;;  %v312_v12 = vld [vmem:[%s1487_s2 + $0x8] sm:$0xff]  ;;  %s948_s12 = sshll.u32 %s296_s19, 4  ;;  %s934_s28 = scalar_lea.sflag [#allocation4], %s1345_s17  ;;  %s949_s12 = int_to_ptr.vmem [resolvable:$true] %s948_s12 }
  0x3a   : > { %377 = vmatpush1.msra.mxu0 %v303_v4  ;;  %466 = vmatpush1.msra.mxu1 %v305_v5  ;;  %v308_v13 = vld [vmem:[%s1486_s1 + $0x8] sm:$0xff]  ;;  %v313_v14 = vld [vmem:[%s1487_s2 + $0x10] sm:$0xff]  ;;  %v311_v15 = vld [vmem:[%s1487_s2] sm:$0xff]  ;;  %s1133_s29 = scalar_lea.vmem %s949_s12, 512  ;;  %p1502_p12 = scmp.ne.s32.totalorder %s1497_s13, 0 }
  0x3b   : > { %378 = vmatprep.subr.mxu0 %v300_v6  ;;  %467 = vmatprep.subr.mxu1 %v302_v7  ;;  %v309_v16 = vld [vmem:[%s1486_s1 + $0x10] sm:$0xff]  ;;  %v549_v17 = vld [vmem:[%s1489_s4 + $0x18] sm:$0xff]  ;;  %v547_v20 = vld [vmem:[%s1489_s4 + $0x8] sm:$0xff]  ;;  %p1134_p11 = scmp.ne.s32.totalorder %s949_s12, %s1133_s29  ;;  %s1205_s21 = smov [#allocation5]  }
  0x3c   : > { %379 = vmatpush1.msra.mxu0 %v299_v8  ;;  %468 = vmatpush1.msra.mxu1 %v301_v9  ;;  %v548_v18 = vld [vmem:[%s1489_s4 + $0x10] sm:$0xff]  ;;  %v310_v19 = vld [vmem:[%s1486_s1 + $0x18] sm:$0xff]  ;;  %v546_v21 = vld [vmem:[%s1489_s4] sm:$0xff]  ;;  %s1137_s9 = sshll.u32 %s1205_s21, 4  ;;  %s1138_s9 = int_to_ptr.vmem [resolvable:$false] %s1137_s9 }
  0x3d   : > { %1027 = vmatmul.mubr.msk.f32.vlgmr.msra.gmra.mxu0 %vm335_vm0, %v307_v10  ;;  %1031 = vmatmul.mubr.msk.f32.vlgmr.msra.gmra.mxu1 %vm335_vm0, %v307_v10  ;;  %v778_v22 = vld [vmem:[%s1491_s6] sm:$0xff]  ;;  %p1135_p13 = pnand %p1134_p11, %p1502_p12  ;;  %s1139_s8 = scalar_lea.vmem %s1138_s9, 1024 }
  0x3e   : > { %418 = vmatprep.mubr.f32.mxu0 %v1203_v0  ;;  %507 = vmatprep.mubr.f32.mxu1 %v1203_v0  ;;  %p1140_p5 = scmp.lt.s32.totalorder %s949_s12, %s1138_s9  ;;  %p1141_p7 = scmp.lt.s32.totalorder %s1139_s8, %s1133_s29 }
  0x3f   : > { %332 = vperm.xlu0 %1103, %v314_v11   ;;  %322 = vperm.xlu1 %1104, %v312_v12   ;;  %v542_v12 = vld [vmem:[%s1488_s3] sm:$0xff]  ;;  %p1136_p4 = pneg %p1135_p13 }
  0x40   : > { %p1142_p8 = por %p1141_p7, %p1140_p5 }
  0x41   : > { %1028 = vmatmul.mubr.msk.f32.gmra.mxu0 %vm335_vm0, %v308_v13  ;;  %1032 = vmatmul.mubr.msk.f32.gmra.mxu1 %vm335_vm0, %v308_v13  ;;  %v543_v13 = vld [vmem:[%s1488_s3 + $0x8] sm:$0xff] }
  0x42   : > { %424 = vmatprep.mubr.f32.mxu0 %v1203_v0  ;;  %513 = vmatprep.mubr.f32.mxu1 %v1203_v0  ;;  %p1143_p10 = pnand %p1142_p8, %p1136_p4 }
  0x43   : > { %327 = vperm.xlu0 %1103, %v313_v14   ;;  %317 = vperm.xlu1 %1104, %v311_v15   ;;  %v544_v14 = vld [vmem:[%s1488_s3 + $0x10] sm:$0xff]  ;;  %v545_v15 = vld [vmem:[%s1488_s3 + $0x18] sm:$0xff] }
  0x45   : > { %1029 = vmatmul.mubr.msk.f32.gmra.mxu0 %vm335_vm0, %v309_v16  ;;  %1033 = vmatmul.mubr.msk.f32.gmra.mxu1 %vm335_vm0, %v309_v16 }
  0x46   : > { %430 = vmatprep.mubr.f32.mxu0 %v1203_v0  ;;  %519 = vmatprep.mubr.f32.mxu1 %v1203_v0 }
  0x47   : > { %567 = vperm.xlu0 %1103, %v549_v17   ;;  %562 = vperm.xlu1 %1104, %v548_v18  }
  0x49   : > { %1030 = vmatmul.mubr.msk.f32.gmra.mxu0 %vm335_vm0, %v310_v19  ;;  %1034 = vmatmul.mubr.msk.f32.gmra.mxu1 %vm335_vm0, %v310_v19 }
  0x4a   : > { %647 = vmatprep.mubr.f32.mxu0 %v1203_v0  ;;  %736 = vmatprep.mubr.f32.mxu1 %v1203_v0 }
  0x4b   : > { %557 = vperm.xlu0 %1103, %v547_v20   ;;  %552 = vperm.xlu1 %1104, %v546_v21  }
  0x4f   : > { %781 = vperm.xlu0 %1103, %v778_v22  }
  0xba   : > { %v333_v31 = vpop.permute.xlu0 %332  ;;  %v323_v36 = vpop.permute.xlu1 %322 }
  0xbe   : > { %v328_v39 = vpop.permute.xlu0 %327  ;;  %v318_v50 = vpop.permute.xlu1 %317 }
  0xfd   : > { %v414_v23 = vpop.f32.mrf.mxu0  ;;  %v503_v24 = vpop.f32.mrf.mxu1 }
  0xfe   : > { %v415_v63 = vadd.f32 %v414_v23, %v318_v50  ;;  %v504_v1 = vadd.f32 %v503_v24, %v318_v50 }
  0xff   : > { %v416_v25 = vpop.f32.mrf.mxu0  ;;  %v505_v26 = vpop.f32.mrf.mxu1 }
 0x100   : > { %v417_v59 = vadd.f32 %v416_v25, %v318_v50  ;;  %v506_v60 = vadd.f32 %v505_v26, %v318_v50  ;;  %v526_v10 = vmax.f32 %v415_v63, 0.0  ;;  %v528_v11 = vmax.f32 %v504_v1, 0.0  ;;  %v568_v26 = vpop.permute.xlu0 %567 }
 0x101   : > { %v420_v27 = vpop.f32.mrf.mxu0  ;;  %v509_v28 = vpop.f32.mrf.mxu1 }
 0x102   : > { %v421_v55 = vadd.f32 %v420_v27, %v323_v36  ;;  %v510_v56 = vadd.f32 %v509_v28, %v323_v36  ;;  %v527_v8 = vmax.f32 %v417_v59, 0.0  ;;  %v529_v9 = vmax.f32 %v506_v60, 0.0 }
 0x103   : > { %v422_v29 = vpop.f32.mrf.mxu0  ;;  %v511_v30 = vpop.f32.mrf.mxu1 }
 0x104   : > { %v423_v51 = vadd.f32 %v422_v29, %v323_v36  ;;  %v512_v52 = vadd.f32 %v511_v30, %v323_v36  ;;  %v530_v6 = vmax.f32 %v421_v55, 0.0  ;;  %v532_v7 = vmax.f32 %v510_v56, 0.0  ;;  %v563_v29 = vpop.permute.xlu1 %562 }
 0x105   : > { %v426_v32 = vpop.f32.mrf.mxu0  ;;  %v515_v33 = vpop.f32.mrf.mxu1 }
 0x106   : > { %v427_v48 = vadd.f32 %v426_v32, %v328_v39  ;;  %v516_v49 = vadd.f32 %v515_v33, %v328_v39  ;;  %v531_v4 = vmax.f32 %v423_v51, 0.0  ;;  %v533_v5 = vmax.f32 %v512_v52, 0.0 }
 0x107   : > { %v428_v34 = vpop.f32.mrf.mxu0  ;;  %v517_v35 = vpop.f32.mrf.mxu1 }
 0x108   : > { %v429_v44 = vadd.f32 %v428_v34, %v328_v39  ;;  %v518_v45 = vadd.f32 %v517_v35, %v328_v39  ;;  %v534_v2 = vmax.f32 %v427_v48, 0.0  ;;  %v536_v3 = vmax.f32 %v516_v49, 0.0  ;;  %v558_v39 = vpop.permute.xlu0 %557 }
 0x109   : > { %v432_v37 = vpop.f32.mrf.mxu0  ;;  %v521_v38 = vpop.f32.mrf.mxu1 }
 0x10a   : > { %v433_v40 = vadd.f32 %v432_v37, %v333_v31  ;;  %v522_v41 = vadd.f32 %v521_v38, %v333_v31  ;;  %v535_v61 = vmax.f32 %v429_v44, 0.0  ;;  %v537_v62 = vmax.f32 %v518_v45, 0.0 }
 0x10b   : > { %v434_v42 = vpop.f32.mrf.mxu0  ;;  %v523_v43 = vpop.f32.mrf.mxu1 }
 0x10c   : > { %v435_v46 = vadd.f32 %v434_v42, %v333_v31  ;;  %v524_v47 = vadd.f32 %v523_v43, %v333_v31  ;;  %v538_v57 = vmax.f32 %v433_v40, 0.0  ;;  %v540_v58 = vmax.f32 %v522_v41, 0.0 }
 0x10e   : > { %v539_v53 = vmax.f32 %v435_v46, 0.0  ;;  %v541_v54 = vmax.f32 %v524_v47, 0.0  ;;  %v553_v46 = vpop.permute.xlu1 %552 }
 0x110   : > { %607 = vmatprep.subr.mxu0 %v539_v53  ;;  %696 = vmatprep.subr.mxu1 %v541_v54 }
 0x111   : > { %608 = vmatpush1.msra.mxu0 %v538_v57  ;;  %697 = vmatpush1.msra.mxu1 %v540_v58 }
 0x112   : > { %609 = vmatprep.subr.mxu0 %v535_v61  ;;  %698 = vmatprep.subr.mxu1 %v537_v62 }
 0x113   : > { %610 = vmatpush1.msra.mxu0 %v534_v2  ;;  %699 = vmatpush1.msra.mxu1 %v536_v3 }
 0x114   : > { %611 = vmatprep.subr.mxu0 %v531_v4  ;;  %700 = vmatprep.subr.mxu1 %v533_v5  ;;  %v777_v4 = vld [vmem:[%s1490_s5] sm:$0xff]  ;;  %v782_v5 = vpop.permute.xlu0 %781 }
 0x115   : > { %612 = vmatpush1.msra.mxu0 %v530_v6  ;;  %701 = vmatpush1.msra.mxu1 %v532_v7 }
 0x116   : > { %613 = vmatprep.subr.mxu0 %v527_v8  ;;  %702 = vmatprep.subr.mxu1 %v529_v9 }
 0x117   : > { %614 = vmatpush1.msra.mxu0 %v526_v10  ;;  %703 = vmatpush1.msra.mxu1 %v528_v11 }
 0x118   : > { %1035 = vmatmul.mubr.msk.f32.vlgmr.msra.gmra.mxu0 %vm570_vm1, %v542_v12  ;;  %1039 = vmatmul.mubr.msk.f32.vlgmr.msra.gmra.mxu1 %vm570_vm1, %v542_v12 }
 0x119   : > { %653 = vmatprep.mubr.f32.mxu0 %v1203_v0  ;;  %742 = vmatprep.mubr.f32.mxu1 %v1203_v0 }
 0x11c   : > { %1036 = vmatmul.mubr.msk.f32.gmra.mxu0 %vm570_vm1, %v543_v13  ;;  %1040 = vmatmul.mubr.msk.f32.gmra.mxu1 %vm570_vm1, %v543_v13 }
 0x11d   : > { %659 = vmatprep.mubr.f32.mxu0 %v1203_v0  ;;  %748 = vmatprep.mubr.f32.mxu1 %v1203_v0 }
 0x120   : > { %1037 = vmatmul.mubr.msk.f32.gmra.mxu0 %vm570_vm1, %v544_v14  ;;  %1041 = vmatmul.mubr.msk.f32.gmra.mxu1 %vm570_vm1, %v544_v14 }
 0x121   : > { %665 = vmatprep.mubr.f32.mxu0 %v1203_v0  ;;  %754 = vmatprep.mubr.f32.mxu1 %v1203_v0 }
 0x124   : > { %1038 = vmatmul.mubr.msk.f32.gmra.mxu0 %vm570_vm1, %v545_v15  ;;  %1042 = vmatmul.mubr.msk.f32.gmra.mxu1 %vm570_vm1, %v545_v15 }
 0x125   : > { %851 = vmatprep.mubr.f32.mxu0 %v1203_v0  ;;  %922 = vmatprep.mubr.f32.mxu1 %v1203_v0 }
 0x1d8   : > { %v649_v16 = vpop.f32.mrf.mxu0  ;;  %v738_v17 = vpop.f32.mrf.mxu1 }
 0x1d9   : > { %v650_v55 = vadd.f32 %v649_v16, %v553_v46  ;;  %v739_v56 = vadd.f32 %v738_v17, %v553_v46 }
 0x1da   : > { %v651_v18 = vpop.f32.mrf.mxu0  ;;  %v740_v19 = vpop.f32.mrf.mxu1 }
 0x1db   : > { %v652_v51 = vadd.f32 %v651_v18, %v553_v46  ;;  %v741_v52 = vadd.f32 %v740_v19, %v553_v46  ;;  %v761_v2 = vmax.f32 %v650_v55, 0.0  ;;  %v763_v3 = vmax.f32 %v739_v56, 0.0 }
 0x1dc   : > { %v655_v20 = vpop.f32.mrf.mxu0  ;;  %v744_v21 = vpop.f32.mrf.mxu1 }
 0x1dd   : > { %v656_v47 = vadd.f32 %v655_v20, %v558_v39  ;;  %v745_v48 = vadd.f32 %v744_v21, %v558_v39  ;;  %v762_v63 = vmax.f32 %v652_v51, 0.0  ;;  %v764_v1 = vmax.f32 %v741_v52, 0.0 }
 0x1de   : > { %v657_v22 = vpop.f32.mrf.mxu0  ;;  %v746_v23 = vpop.f32.mrf.mxu1 }
 0x1df   : > { %v658_v42 = vadd.f32 %v657_v22, %v558_v39  ;;  %v747_v43 = vadd.f32 %v746_v23, %v558_v39  ;;  %v765_v61 = vmax.f32 %v656_v47, 0.0  ;;  %v767_v62 = vmax.f32 %v745_v48, 0.0 }
 0x1e0   : > { %v661_v24 = vpop.f32.mrf.mxu0  ;;  %v750_v25 = vpop.f32.mrf.mxu1 }
 0x1e1   : > { %v662_v40 = vadd.f32 %v661_v24, %v563_v29  ;;  %v751_v41 = vadd.f32 %v750_v25, %v563_v29  ;;  %v766_v59 = vmax.f32 %v658_v42, 0.0  ;;  %v768_v60 = vmax.f32 %v747_v43, 0.0 }
 0x1e2   : > { %v663_v27 = vpop.f32.mrf.mxu0  ;;  %v752_v28 = vpop.f32.mrf.mxu1 }
 0x1e3   : > { %v664_v35 = vadd.f32 %v663_v27, %v563_v29  ;;  %v753_v36 = vadd.f32 %v752_v28, %v563_v29  ;;  %v769_v57 = vmax.f32 %v662_v40, 0.0  ;;  %v771_v58 = vmax.f32 %v751_v41, 0.0 }
 0x1e4   : > { %v667_v30 = vpop.f32.mrf.mxu0  ;;  %v756_v31 = vpop.f32.mrf.mxu1 }
 0x1e5   : > { %v668_v32 = vadd.f32 %v667_v30, %v568_v26  ;;  %v757_v33 = vadd.f32 %v756_v31, %v568_v26  ;;  %v770_v53 = vmax.f32 %v664_v35, 0.0  ;;  %v772_v54 = vmax.f32 %v753_v36, 0.0 }
 0x1e6   : > { %v669_v34 = vpop.f32.mrf.mxu0  ;;  %v758_v0 = vpop.f32.mrf.mxu1 }
 0x1e7   : > { %v670_v37 = vadd.f32 %v669_v34, %v568_v26  ;;  %v759_v38 = vadd.f32 %v758_v0, %v568_v26  ;;  %v773_v49 = vmax.f32 %v668_v32, 0.0  ;;  %v775_v50 = vmax.f32 %v757_v33, 0.0 }
 0x1e9   : > { %v774_v44 = vmax.f32 %v670_v37, 0.0  ;;  %v776_v45 = vmax.f32 %v759_v38, 0.0 }
 0x1eb   : > { %811 = vmatprep.subr.mxu0 %v774_v44  ;;  %882 = vmatprep.subr.mxu1 %v776_v45 }
 0x1ec   : > { %812 = vmatpush1.msra.mxu0 %v773_v49  ;;  %883 = vmatpush1.msra.mxu1 %v775_v50 }
 0x1ed   : > { %813 = vmatprep.subr.mxu0 %v770_v53  ;;  %884 = vmatprep.subr.mxu1 %v772_v54 }
 0x1ee   : > { %814 = vmatpush1.msra.mxu0 %v769_v57  ;;  %885 = vmatpush1.msra.mxu1 %v771_v58 }
 0x1ef   : > { %815 = vmatprep.subr.mxu0 %v766_v59  ;;  %886 = vmatprep.subr.mxu1 %v768_v60 }
 0x1f0   : > { %816 = vmatpush1.msra.mxu0 %v765_v61  ;;  %887 = vmatpush1.msra.mxu1 %v767_v62 }
 0x1f1   : > { %817 = vmatprep.subr.mxu0 %v762_v63  ;;  %888 = vmatprep.subr.mxu1 %v764_v1 }
 0x1f2   : > { %818 = vmatpush1.msra.mxu0 %v761_v2  ;;  %889 = vmatpush1.msra.mxu1 %v763_v3 }
 0x1f3   : > { %1043 = vmatmul.mubr.msk.f32.vlgmr.msra.gmra.mxu0 %vm570_vm1, %v777_v4  ;;  %1044 = vmatmul.mubr.msk.f32.vlgmr.msra.gmra.mxu1 %vm570_vm1, %v777_v4 }
 0x2b3   : > { %v853_v6 = vpop.f32.mrf.mxu0  ;;  %v924_v7 = vpop.f32.mrf.mxu1 }
 0x2b4   : > { %v854_v8 = vadd.f32 %v853_v6, %v782_v5  ;;  %v925_v9 = vadd.f32 %v924_v7, %v782_v5 }
 0x2b5   : > { %v855_v10 = vpop.f32.mrf.mxu0  ;;  %v926_v11 = vpop.f32.mrf.mxu1 }
 0x2b6   : > { %929 = vst [vmem:[%s296_s19] sm:$0xff] %v854_v8  ;;  %931 = vst [vmem:[%s296_s19 + $0x10] sm:$0xff] %v925_v9  ;;  %v856_v12 = vadd.f32 %v855_v10, %v782_v5  ;;  %v927_v13 = vadd.f32 %v926_v11, %v782_v5 }
 0x2b8   : > { %930 = vst [vmem:[%s296_s19 + $0x8] sm:$0xff] %v856_v12  ;;  %932 = vst [vmem:[%s296_s19 + $0x18] sm:$0xff] %v927_v13 }
 0x2b9   : > { %1146 = shalt.err (!%p1143_p10)
}
 0x2ba   : > { %s1147_s16 = scalar_lea.hbm %s1448_s23, 512  ;;  %s1151_s18 = scalar_lea.hbm %s1492_s7, 1024 }
 0x2bb   : > { %p1148_p1 = scmp.ne.s32.totalorder %s1448_s23, %s1147_s16  ;;  %p1152_p0 = scmp.lt.s32.totalorder %s1448_s23, %s1492_s7 }
 0x2bc   : > { %p1153_p2 = scmp.lt.s32.totalorder %s1151_s18, %s1147_s16 }
 0x2bd   : > { %p1149_p3 = pnand %p1148_p1, %p1502_p12 }
 0x2be   : > { %p1154_p6 = por %p1153_p2, %p1152_p0 }
 0x2bf   : > { %p1150_p9 = pneg %p1149_p3 }
 0x2c1   : > { %p1155_p11 = pnand %p1154_p6, %p1150_p9 }
 0x2c3   : > { %1158 = shalt.err (!%p1155_p11)
}
 0x2c4   : > { %1054 = dma.vmem_to_hbm [thread:$0]  (%p1502_p12), %s949_s12, 512, %s1448_s23, %s934_s28  }
 0x2c5 PF: > { %s960_s20 = sand.u32 1, %s1185_s24   ;;  %p1503_p13 = scmp.ne.s32.totalorder %s1498_s14, 0 }
 0x2c6   : > { %p1504_p4 = scmp.ge.s32.totalorder %s1197_s27, 2  ;;  %s961_s22 = scalar_lea.sflag [#allocation4], %s960_s20 }
 0x2c8   : > { %p1061_p5 = pnand %p1504_p4, %p1503_p13 }
 0x2ca   : > { %p1062_p7 = pneg %p1061_p5 }
 0x2cc   : > { %1180 = dma.done.wait (%p1062_p7), %s961_s22, 512  }
 0x2cd   : > { %1182 = vsyncadd (%p1062_p7), %s961_s22, 4294966784  ;;  %p20_p8 = scmp.ge.s32.totalorder %s1271_s30, 4   ;;  %s1505_s24 = smov %s1189_s25 }
 0x2ce   : > { %s1506_s25 = smov %s1193_s26  ;;  %s1507_s26 = smov %s1283_s10 }
 0x2cf   : > { %s1508_s27 = smov %s1271_s30  ;;  %22 = sbr.rel (!%p20_p8) target bundleno = 5 (0x5), region = 93 }
 0x2d4   :  { %966 = vsyncpa [#allocation3], 1 }
 0x2d5   :  { %968 = vsyncpa [#allocation3 + $0x1], 1 }
 0x2d6   :  { %969 = vsyncpa [#allocation4], 1 }
 0x2d7   :  { %971 = vsyncpa [#allocation4 + $0x1], 1 }

</bundles_post_ra>
